<compile_context>
chip_gen: v5e
topology: v5e:2x2
jax: 0.10.0
libtpu: 0.0.40
codegen_flags: <defaults>
</compile_context>

<pallas_src>
import functools

import jax
import jax.numpy as jnp
from jax.experimental import pallas as pl
from jax.experimental.pallas import tpu as pltpu

_LANES = 128
_PAD_TOKEN_ID = 1  # RoBERTa pad token (input_ids.ne(1) in the reference)


# ----------------------------------------------------------------------------
# Pallas kernel: CLS gather + classification head of RobertaClass.forward
#   pooled = emb_table[cls_id]      (zero row if cls_id == pad)
#   pooler = tanh(linear1(pooled))                  # activation == tanh
#   logits = linear2(pooler); prob = sigmoid(logits)
#   per_ex = log(prob[:,0]+1e-10)*y + log(1-prob[:,0]+1e-10)*(1-y)
# Outputs: prob slab (B_pad, 128) f32 (col0/col1), per-tile BCE partial sums.
# ----------------------------------------------------------------------------
def _head_kernel(ids_ref, emb_ref, w1_ref, b1_ref, w2t_ref, b2_ref, labels_ref,
                 prob_ref, loss_ref, pooled_vmem, gather_sem,
                 *, pad_id, zero_row, batch):
    tb = prob_ref.shape[0]
    base = pl.program_id(0) * tb

    # ---- fused CLS gather: pooled_vmem[r] <- emb_table[cls_ids[base + r]] ---
    # Pad CLS tokens are redirected to the appended all-zero table row, which
    # is equivalent to the reference's mask-multiply by (cls_id != 1).
    @pl.loop(0, tb)
    def _start(r):
        cid = ids_ref[base + r]
        src = jnp.where(cid == pad_id, zero_row, cid)
        pltpu.make_async_copy(emb_ref.at[src], pooled_vmem.at[r],
                              gather_sem).start()

    @pl.loop(0, tb)
    def _wait(r):
        pltpu.make_async_copy(emb_ref.at[0], pooled_vmem.at[r],
                              gather_sem).wait()

    # ---- linear1 on the MXU: bf16 x bf16 -> f32 accumulate, tanh in f32 -----
    pooled = pooled_vmem[...].astype(jnp.bfloat16)               # (TB, 768)
    h = jnp.dot(pooled, w1_ref[...],
                preferred_element_type=jnp.float32)              # (TB, H) f32
    h = jnp.tanh(h + b1_ref[...])

    # ---- linear2 (out_features == 2): VPU mul + lane reduce, bias from SMEM -
    w2t = w2t_ref[...]                                           # (2, H) f32
    z0 = jnp.sum(h * w2t[0:1, :], axis=-1, keepdims=True) + b2_ref[0]
    z1 = jnp.sum(h * w2t[1:2, :], axis=-1, keepdims=True) + b2_ref[1]

    # sigmoid via single EUP op: sigmoid(x) = 0.5 * (1 + tanh(x / 2))
    p0 = 0.5 * (1.0 + jnp.tanh(0.5 * z0))                        # (TB, 1)
    p1 = 0.5 * (1.0 + jnp.tanh(0.5 * z1))                        # (TB, 1)

    # ---- lane-dense prob slab (single unmasked store) -----------------------
    lane = jax.lax.broadcasted_iota(jnp.int32, prob_ref.shape, 1)
    prob_ref[...] = jnp.where(lane == 0, p0, jnp.where(lane == 1, p1, 0.0))

    # ---- per-tile BCE partial sum (padded rows excluded) --------------------
    y = labels_ref[...]                                          # (TB, 1) f32
    per_ex = (jnp.log(p0 + 1e-10) * y
              + jnp.log(1.0 - p0 + 1e-10) * (1.0 - y))           # (TB, 1)
    row = base + jax.lax.broadcasted_iota(jnp.int32, per_ex.shape, 0)
    tile_sum = jnp.sum(jnp.where(row < batch, per_ex, 0.0))
    lrow = jax.lax.broadcasted_iota(jnp.int32, loss_ref.shape, 0)
    llane = jax.lax.broadcasted_iota(jnp.int32, loss_ref.shape, 1)
    loss_ref[...] = jnp.where((lrow == 0) & (llane == 0), tile_sum, 0.0)


def _round_up(x, m):
    return (x + m - 1) // m * m


def _pick_batch_tile(b_pad):
    """Cap tile at 128 rows; split mid-size batches so the grid has >=2 steps
    (v7x megacore) and vreg pressure stays bounded."""
    if b_pad <= 128:
        return b_pad
    if b_pad <= 256:
        return _round_up((b_pad + 1) // 2, 16)
    return 128


# ----------------------------------------------------------------------------
# One-time parameter preparation (kernel-ready dtype / layout).  NOT in the
# per-call jitted path.
# ----------------------------------------------------------------------------
def prepare_params(raw):
    d_enc = raw["emb_table"].shape[1]
    emb = jnp.concatenate(
        [raw["emb_table"].astype(jnp.float32),
         jnp.zeros((1, d_enc), jnp.float32)], axis=0)            # last row = 0
    return {
        "emb_table": emb,                                        # (V+1, 768) f32, HBM
        "w1": raw["w1"].astype(jnp.bfloat16),                    # (768, H) bf16 MXU operand
        "b1": raw["b1"].reshape(1, -1).astype(jnp.float32),      # (1, H) f32
        "w2t": raw["w2"].T.astype(jnp.float32),                  # (2, H) lane-dense rows
        "b2": raw["b2"].reshape(-1).astype(jnp.float32),         # (2,) SMEM scalars
    }


# ----------------------------------------------------------------------------
# Head: cls_ids (B,) int32, labels (B,) -> (prob (B, 2), loss scalar)
# ----------------------------------------------------------------------------
def roberta_head(cls_ids, labels, p):
    B = cls_ids.shape[0]
    d_in = p["emb_table"].shape[1]
    H = p["w1"].shape[1]
    zero_row = p["emb_table"].shape[0] - 1

    B_pad = _round_up(B, 16)                 # bf16 packs 16 sublanes per vreg
    TB = _pick_batch_tile(B_pad)
    B_pad = _round_up(B_pad, TB)
    num_tiles = B_pad // TB

    ids = cls_ids.astype(jnp.int32)
    lab = labels.astype(jnp.float32).reshape(-1, 1)
    if B_pad != B:
        ids = jnp.pad(ids, (0, B_pad - B), constant_values=_PAD_TOKEN_ID)
        lab = jnp.pad(lab, ((0, B_pad - B), (0, 0)))

    kernel = functools.partial(_head_kernel, pad_id=_PAD_TOKEN_ID,
                               zero_row=zero_row, batch=B)

    prob_slab, loss_part = pl.pallas_call(
        kernel,
        out_shape=(
            jax.ShapeDtypeStruct((B_pad, _LANES), jnp.float32),
            jax.ShapeDtypeStruct((num_tiles * 8, _LANES), jnp.float32),
        ),
        grid_spec=pltpu.PrefetchScalarGridSpec(
            num_scalar_prefetch=1,                               # cls_ids -> SMEM
            grid=(num_tiles,),
            in_specs=[
                pl.BlockSpec(memory_space=pl.ANY),               # emb_table (HBM)
                pl.BlockSpec((d_in, H), lambda i, ids: (0, 0)),  # w1 (bf16)
                pl.BlockSpec((1, H), lambda i, ids: (0, 0)),     # b1 (f32)
                pl.BlockSpec((2, H), lambda i, ids: (0, 0)),     # w2^T (f32)
                pl.BlockSpec(memory_space=pltpu.MemorySpace.SMEM),  # b2 (2,)
                pl.BlockSpec((TB, 1), lambda i, ids: (i, 0)),    # labels (f32)
            ],
            out_specs=[
                pl.BlockSpec((TB, _LANES), lambda i, ids: (i, 0)),
                pl.BlockSpec((8, _LANES), lambda i, ids: (i, 0)),
            ],
            scratch_shapes=[
                pltpu.VMEM((TB, d_in), jnp.float32),             # gathered CLS rows
                pltpu.SemaphoreType.DMA(()),
            ],
        ),
        compiler_params=pltpu.CompilerParams(
            dimension_semantics=("parallel",)),
    )(ids, p["emb_table"], p["w1"], p["b1"], p["w2t"], p["b2"], lab)

    prob = prob_slab[:B, 0:2]                                    # (B, 2)
    loss = -jnp.sum(loss_part[:, 0]) / B                         # batch mean
    return prob, loss


# ----------------------------------------------------------------------------
# Full RobertaClass.forward (eval mode, pooler_type='cls', labels provided)
# ----------------------------------------------------------------------------
def roberta_class_forward(input_ids, labels, prepared):
    # TODO(synk): the real `self.encoder` is an external pretrained RoBERTa
    # model; it is replaced by a deterministic embedding-lookup surrogate.
    # With pooler_type == 'cls' only token 0 of the encoder output is consumed,
    # so only the CLS ids are handed to the kernel (the gather, the pad-mask
    # and the bf16 cast all happen in-kernel).  Dropout is identity in eval.
    cls_ids = input_ids[:, 0]
    prob, loss = roberta_head(cls_ids, labels, prepared)
    return loss, prob


if __name__ == "__main__":
    # Small, deterministic shapes consistent with the module:
    #   encoder hidden_size = 768 (implied by .view(-1, 768)),
    #   args.hidden_size    = 128,  num classes = 2.
    B, S, VOCAB = 8, 8, 64
    D_ENC, D_HID = 768, 128

    key = jax.random.PRNGKey(0)
    k_emb, k_w1, k_b1, k_w2, k_b2, k_ids, k_lab = jax.random.split(key, 7)

    raw_params = {
        "emb_table": 0.02 * jax.random.normal(k_emb, (VOCAB, D_ENC), jnp.float32),
        "w1": 0.02 * jax.random.normal(k_w1, (D_ENC, D_HID), jnp.float32),
        "b1": 0.01 * jax.random.normal(k_b1, (1, D_HID), jnp.float32),
        "w2": 0.02 * jax.random.normal(k_w2, (D_HID, 2), jnp.float32),
        "b2": 0.01 * jax.random.normal(k_b2, (1, 2), jnp.float32),
    }
    prepared = prepare_params(raw_params)          # one-time, outside jit

    input_ids = jax.random.randint(k_ids, (B, S), 0, VOCAB, dtype=jnp.int32)
    # force some padding (token id 1) so attention_mask handling is non-trivial,
    # including one example whose CLS token is pad (exercises the zero-row path)
    input_ids = input_ids.at[:, -2:].set(1)
    input_ids = input_ids.at[0, 0].set(1)
    labels = jax.random.bernoulli(k_lab, 0.5, (B,)).astype(jnp.int32)

    fwd = jax.jit(roberta_class_forward)
    loss, prob = fwd(input_ids, labels, prepared)
    jax.block_until_ready((loss, prob))

    # pure-JAX f32 reference of the head (kernel uses bf16 MXU inputs, so allow
    # a small tolerance for the intentional bf16 rounding of the first matmul).
    cls_ids = input_ids[:, 0]
    pooled_ref = (raw_params["emb_table"][cls_ids]
                  * (cls_ids != 1).astype(jnp.float32)[:, None])
    h_ref = jnp.tanh(pooled_ref @ raw_params["w1"] + raw_params["b1"])
    logits_ref = h_ref @ raw_params["w2"] + raw_params["b2"]
    prob_ref = jax.nn.sigmoid(logits_ref)
    y = labels.astype(jnp.float32)
    loss_ref = -jnp.mean(jnp.log(prob_ref[:, 0] + 1e-10) * y
                         + jnp.log(1.0 - prob_ref[:, 0] + 1e-10) * (1.0 - y))

    assert jnp.allclose(prob, prob_ref, atol=2e-3), "prob mismatch"
    assert jnp.allclose(loss, loss_ref, atol=2e-3), "loss mismatch"

    print("KERNEL_OK")
</pallas_src>

<mosaic_0001>
module attributes {stable_mosaic.version = 11 : i64} {
  func.func @_head_kernel(%arg0: i32, %arg1: memref<16xi32, #tpu.memory_space<smem>>, %arg2: memref<65x768xf32, #tpu.memory_space<any>>, %arg3: memref<768x128xbf16, #tpu.memory_space<vmem>>, %arg4: memref<1x128xf32, #tpu.memory_space<vmem>>, %arg5: memref<2x128xf32, #tpu.memory_space<vmem>>, %arg6: memref<2xf32, #tpu.memory_space<smem>>, %arg7: memref<16x1xf32, #tpu.memory_space<vmem>>, %arg8: memref<16x128xf32, #tpu.memory_space<vmem>>, %arg9: memref<8x128xf32, #tpu.memory_space<vmem>>, %arg10: memref<16x768xf32, #tpu.memory_space<vmem>>, %arg11: memref<!tpu.dma_semaphore, #tpu.memory_space<semaphore_mem>>) attributes {dimension_semantics = [#tpu.dimension_semantics<parallel>], iteration_bounds = array<i64: 1>, scalar_prefetch = 1 : i64, scratch_operands = 2 : i64, tpu.core_type = #tpu.core_type<tc>, window_params = [{}, {pipeline_mode = #tpu.pipeline_mode<synchronous>, transform_indices = @transform_1, window_bounds = array<i64: 768, 128>}, {pipeline_mode = #tpu.pipeline_mode<synchronous>, transform_indices = @transform_2, window_bounds = array<i64: 1, 128>}, {pipeline_mode = #tpu.pipeline_mode<synchronous>, transform_indices = @transform_3, window_bounds = array<i64: 2, 128>}, {transform_indices = @transform_4, window_bounds = array<i64: 2>}, {transform_indices = @transform_5, window_bounds = array<i64: 16, 1>}, {transform_indices = @transform_6, window_bounds = array<i64: 16, 128>}, {transform_indices = @transform_7, window_bounds = array<i64: 8, 128>}]} {
    %c16_i32 = arith.constant 16 : i32
    %0 = arith.muli %arg0, %c16_i32 : i32
    %c0_i32 = arith.constant 0 : i32
    %c16_i32_0 = arith.constant 16 : i32
    %1 = arith.addi %c0_i32, %c16_i32_0 : i32
    %c1_i32 = arith.constant 1 : i32
    scf.for %arg12 = %c0_i32 to %1 step %c1_i32  : i32 {
      %c1_i32_40 = arith.constant 1 : i32
      %91 = arith.muli %arg12, %c1_i32_40 : i32
      %c0_i32_41 = arith.constant 0 : i32
      %92 = arith.addi %c0_i32_41, %91 : i32
      %93 = arith.addi %0, %92 : i32
      %94 = arith.index_cast %93 : i32 to index
      %95 = memref.load %arg1[%94] : memref<16xi32, #tpu.memory_space<smem>>
      %c1_i32_42 = arith.constant 1 : i32
      %96 = arith.cmpi eq, %95, %c1_i32_42 : i32
      %c64_i32 = arith.constant 64 : i32
      %97 = arith.select %96, %c64_i32, %95 : i32
      %c0_i32_43 = arith.constant 0 : i32
      %98 = tpu.memref_slice %arg2[%97, %c0_i32_43] : memref<65x768xf32, #tpu.memory_space<any>> -> memref<1x768xf32, #tpu.memory_space<any>>
      %99 = tpu.memref_squeeze %98 : memref<1x768xf32, #tpu.memory_space<any>> -> memref<768xf32, #tpu.memory_space<any>>
      %c0_i32_44 = arith.constant 0 : i32
      %100 = tpu.memref_slice %arg10[%92, %c0_i32_44] : memref<16x768xf32, #tpu.memory_space<vmem>> -> memref<1x768xf32, #tpu.memory_space<vmem>>
      %101 = tpu.memref_squeeze %100 : memref<1x768xf32, #tpu.memory_space<vmem>> -> memref<768xf32, #tpu.memory_space<vmem>>
      tpu.enqueue_dma source(%99 : memref<768xf32, #tpu.memory_space<any>>) target(%101 : memref<768xf32, #tpu.memory_space<vmem>>) target_semaphore(%arg11 : memref<!tpu.dma_semaphore, #tpu.memory_space<semaphore_mem>>)
    }
    %c16_i32_1 = arith.constant 16 : i32
    %c0_i32_2 = arith.constant 0 : i32
    %c16_i32_3 = arith.constant 16 : i32
    %2 = arith.addi %c0_i32_2, %c16_i32_3 : i32
    %c1_i32_4 = arith.constant 1 : i32
    scf.for %arg12 = %c0_i32_2 to %2 step %c1_i32_4  : i32 {
      %c1_i32_40 = arith.constant 1 : i32
      %91 = arith.muli %arg12, %c1_i32_40 : i32
      %c0_i32_41 = arith.constant 0 : i32
      %92 = arith.addi %c0_i32_41, %91 : i32
      %c0_i32_42 = arith.constant 0 : i32
      %c0_i32_43 = arith.constant 0 : i32
      %93 = tpu.memref_slice %arg2[%c0_i32_42, %c0_i32_43] : memref<65x768xf32, #tpu.memory_space<any>> -> memref<1x768xf32, #tpu.memory_space<any>>
      %94 = tpu.memref_squeeze %93 : memref<1x768xf32, #tpu.memory_space<any>> -> memref<768xf32, #tpu.memory_space<any>>
      %c0_i32_44 = arith.constant 0 : i32
      %95 = tpu.memref_slice %arg10[%92, %c0_i32_44] : memref<16x768xf32, #tpu.memory_space<vmem>> -> memref<1x768xf32, #tpu.memory_space<vmem>>
      %96 = tpu.memref_squeeze %95 : memref<1x768xf32, #tpu.memory_space<vmem>> -> memref<768xf32, #tpu.memory_space<vmem>>
      tpu.wait_dma2 semaphore(%arg11 : memref<!tpu.dma_semaphore, #tpu.memory_space<semaphore_mem>>) src(%94 : memref<768xf32, #tpu.memory_space<any>>) dst(%96 : memref<768xf32, #tpu.memory_space<vmem>>)
    }
    %c16_i32_5 = arith.constant 16 : i32
    %c0 = arith.constant 0 : index
    %c0_6 = arith.constant 0 : index
    %3 = vector.load %arg10[%c0, %c0_6] : memref<16x768xf32, #tpu.memory_space<vmem>>, vector<16x768xf32>
    %4 = arith.truncf %3 : vector<16x768xf32> to vector<16x768xbf16>
    %c0_7 = arith.constant 0 : index
    %c0_8 = arith.constant 0 : index
    %5 = vector.load %arg3[%c0_7, %c0_8] : memref<768x128xbf16, #tpu.memory_space<vmem>>, vector<768x128xbf16>
    %cst = arith.constant dense<0.000000e+00> : vector<16x128xf32>
    %6 = tpu.matmul %4, %5, %cst {dimension_numbers = #tpu.dot_dimension_numbers<[1], [0], [0], [1], [0, 0, 1, 1], [], []>} : vector<16x768xbf16>, vector<768x128xbf16>, vector<16x128xf32> -> vector<16x128xf32>
    %c0_9 = arith.constant 0 : index
    %c0_10 = arith.constant 0 : index
    %7 = vector.load %arg4[%c0_9, %c0_10] : memref<1x128xf32, #tpu.memory_space<vmem>>, vector<1x128xf32>
    %8 = vector.broadcast %7 : vector<1x128xf32> to vector<16x128xf32>
    %9 = arith.addf %6, %8 : vector<16x128xf32>
    %10 = math.tanh %9 : vector<16x128xf32>
    %c0_11 = arith.constant 0 : index
    %c0_12 = arith.constant 0 : index
    %11 = vector.load %arg5[%c0_11, %c0_12] : memref<2x128xf32, #tpu.memory_space<vmem>>, vector<2x128xf32>
    %12 = vector.extract_strided_slice %11 {offsets = [0, 0], sizes = [1, 128], strides = [1, 1]} : vector<2x128xf32> to vector<1x128xf32>
    %13 = vector.broadcast %12 : vector<1x128xf32> to vector<16x128xf32>
    %14 = arith.mulf %10, %13 : vector<16x128xf32>
    %cst_13 = arith.constant dense<0.000000e+00> : vector<16xf32>
    %15 = vector.multi_reduction <add>, %14, %cst_13 [1] : vector<16x128xf32> to vector<16xf32>
    %16 = vector.shape_cast %15 : vector<16xf32> to vector<16x1xf32>
    %c0_14 = arith.constant 0 : index
    %17 = memref.load %arg6[%c0_14] : memref<2xf32, #tpu.memory_space<smem>>
    %18 = vector.broadcast %17 : f32 to vector<16x1xf32>
    %19 = arith.addf %16, %18 : vector<16x1xf32>
    %20 = vector.extract_strided_slice %11 {offsets = [1, 0], sizes = [1, 128], strides = [1, 1]} : vector<2x128xf32> to vector<1x128xf32>
    %21 = vector.broadcast %20 : vector<1x128xf32> to vector<16x128xf32>
    %22 = arith.mulf %10, %21 : vector<16x128xf32>
    %cst_15 = arith.constant dense<0.000000e+00> : vector<16xf32>
    %23 = vector.multi_reduction <add>, %22, %cst_15 [1] : vector<16x128xf32> to vector<16xf32>
    %24 = vector.shape_cast %23 : vector<16xf32> to vector<16x1xf32>
    %c1 = arith.constant 1 : index
    %25 = memref.load %arg6[%c1] : memref<2xf32, #tpu.memory_space<smem>>
    %26 = vector.broadcast %25 : f32 to vector<16x1xf32>
    %27 = arith.addf %24, %26 : vector<16x1xf32>
    %cst_16 = arith.constant 5.000000e-01 : f32
    %28 = vector.broadcast %cst_16 : f32 to vector<16x1xf32>
    %29 = arith.mulf %28, %19 : vector<16x1xf32>
    %30 = math.tanh %29 : vector<16x1xf32>
    %cst_17 = arith.constant 1.000000e+00 : f32
    %31 = vector.broadcast %cst_17 : f32 to vector<16x1xf32>
    %32 = arith.addf %31, %30 : vector<16x1xf32>
    %cst_18 = arith.constant 5.000000e-01 : f32
    %33 = vector.broadcast %cst_18 : f32 to vector<16x1xf32>
    %34 = arith.mulf %33, %32 : vector<16x1xf32>
    %cst_19 = arith.constant 5.000000e-01 : f32
    %35 = vector.broadcast %cst_19 : f32 to vector<16x1xf32>
    %36 = arith.mulf %35, %27 : vector<16x1xf32>
    %37 = math.tanh %36 : vector<16x1xf32>
    %cst_20 = arith.constant 1.000000e+00 : f32
    %38 = vector.broadcast %cst_20 : f32 to vector<16x1xf32>
    %39 = arith.addf %38, %37 : vector<16x1xf32>
    %cst_21 = arith.constant 5.000000e-01 : f32
    %40 = vector.broadcast %cst_21 : f32 to vector<16x1xf32>
    %41 = arith.mulf %40, %39 : vector<16x1xf32>
    %42 = tpu.iota {dimensions = array<i32: 1>} : vector<16x128xi32>
    %c0_i32_22 = arith.constant 0 : i32
    %43 = vector.broadcast %c0_i32_22 : i32 to vector<16x128xi32>
    %44 = arith.cmpi eq, %42, %43 : vector<16x128xi32>
    %c1_i32_23 = arith.constant 1 : i32
    %45 = vector.broadcast %c1_i32_23 : i32 to vector<16x128xi32>
    %46 = arith.cmpi eq, %42, %45 : vector<16x128xi32>
    %cst_24 = arith.constant 0.000000e+00 : f32
    %47 = vector.shape_cast %41 : vector<16x1xf32> to vector<16x1xf32>
    %48 = vector.broadcast %47 : vector<16x1xf32> to vector<16x128xf32>
    %49 = vector.broadcast %cst_24 : f32 to vector<16x128xf32>
    %50 = arith.select %46, %48, %49 : vector<16x128xi1>, vector<16x128xf32>
    %51 = vector.shape_cast %34 : vector<16x1xf32> to vector<16x1xf32>
    %52 = vector.broadcast %51 : vector<16x1xf32> to vector<16x128xf32>
    %53 = arith.select %44, %52, %50 : vector<16x128xi1>, vector<16x128xf32>
    %c0_25 = arith.constant 0 : index
    %c0_26 = arith.constant 0 : index
    %54 = vector.load %arg8[%c0_25, %c0_26] : memref<16x128xf32, #tpu.memory_space<vmem>>, vector<16x128xf32>
    tpu.vector_store %arg8[%c0_25, %c0_26], %53 {strides = array<i32>} : memref<16x128xf32, #tpu.memory_space<vmem>>, vector<16x128xf32>,
    %c0_27 = arith.constant 0 : index
    %c0_28 = arith.constant 0 : index
    %55 = vector.load %arg7[%c0_27, %c0_28] : memref<16x1xf32, #tpu.memory_space<vmem>>, vector<16x1xf32>
    %cst_29 = arith.constant 1.000000e-10 : f32
    %56 = vector.broadcast %cst_29 : f32 to vector<16x1xf32>
    %57 = arith.addf %34, %56 : vector<16x1xf32>
    %58 = math.log %57 : vector<16x1xf32>
    %59 = arith.mulf %58, %55 : vector<16x1xf32>
    %cst_30 = arith.constant 1.000000e+00 : f32
    %60 = vector.broadcast %cst_30 : f32 to vector<16x1xf32>
    %61 = arith.subf %60, %34 : vector<16x1xf32>
    %cst_31 = arith.constant 1.000000e-10 : f32
    %62 = vector.broadcast %cst_31 : f32 to vector<16x1xf32>
    %63 = arith.addf %61, %62 : vector<16x1xf32>
    %64 = math.log %63 : vector<16x1xf32>
    %cst_32 = arith.constant 1.000000e+00 : f32
    %65 = vector.broadcast %cst_32 : f32 to vector<16x1xf32>
    %66 = arith.subf %65, %55 : vector<16x1xf32>
    %67 = arith.mulf %64, %66 : vector<16x1xf32>
    %68 = arith.addf %59, %67 : vector<16x1xf32>
    %69 = tpu.iota {dimensions = array<i32: 0>} : vector<16x1xi32>
    %70 = vector.broadcast %0 : i32 to vector<16x1xi32>
    %71 = arith.addi %70, %69 : vector<16x1xi32>
    %c8_i32 = arith.constant 8 : i32
    %72 = vector.broadcast %c8_i32 : i32 to vector<16x1xi32>
    %73 = arith.cmpi slt, %71, %72 : vector<16x1xi32>
    %cst_33 = arith.constant 0.000000e+00 : f32
    %74 = vector.broadcast %cst_33 : f32 to vector<16x1xf32>
    %75 = arith.select %73, %68, %74 : vector<16x1xi1>, vector<16x1xf32>
    %76 = vector.shape_cast %75 : vector<16x1xf32> to vector<1x16x1xf32>
    %cst_34 = arith.constant dense<0.000000e+00> : vector<1xf32>
    %77 = vector.multi_reduction <add>, %76, %cst_34 [1, 2] : vector<1x16x1xf32> to vector<1xf32>
    %78 = vector.shape_cast %77 : vector<1xf32> to vector<1x1x1xf32>
    %79 = vector.extract %78[0, 0, 0] : f32 from vector<1x1x1xf32>
    %80 = tpu.iota {dimensions = array<i32: 0>} : vector<8x128xi32>
    %81 = tpu.iota {dimensions = array<i32: 1>} : vector<8x128xi32>
    %c0_i32_35 = arith.constant 0 : i32
    %82 = vector.broadcast %c0_i32_35 : i32 to vector<8x128xi32>
    %83 = arith.cmpi eq, %80, %82 : vector<8x128xi32>
    %c0_i32_36 = arith.constant 0 : i32
    %84 = vector.broadcast %c0_i32_36 : i32 to vector<8x128xi32>
    %85 = arith.cmpi eq, %81, %84 : vector<8x128xi32>
    %86 = arith.andi %83, %85 : vector<8x128xi1>
    %cst_37 = arith.constant 0.000000e+00 : f32
    %87 = vector.broadcast %79 : f32 to vector<8x128xf32>
    %88 = vector.broadcast %cst_37 : f32 to vector<8x128xf32>
    %89 = arith.select %86, %87, %88 : vector<8x128xi1>, vector<8x128xf32>
    %c0_38 = arith.constant 0 : index
    %c0_39 = arith.constant 0 : index
    %90 = vector.load %arg9[%c0_38, %c0_39] : memref<8x128xf32, #tpu.memory_space<vmem>>, vector<8x128xf32>
    tpu.vector_store %arg9[%c0_38, %c0_39], %89 {strides = array<i32>} : memref<8x128xf32, #tpu.memory_space<vmem>>, vector<8x128xf32>,
    return
  }
  func.func @transform_1(%arg0: i32, %arg1: memref<16xi32, #tpu.memory_space<smem>>) -> (i32, i32) {
    %c0_i32 = arith.constant 0 : i32
    %c0_i32_0 = arith.constant 0 : i32
    %c0_i32_1 = arith.constant 0 : i32
    return %c0_i32, %c0_i32_0 : i32, i32
  }
  func.func @transform_2(%arg0: i32, %arg1: memref<16xi32, #tpu.memory_space<smem>>) -> (i32, i32) {
    %c0_i32 = arith.constant 0 : i32
    %c0_i32_0 = arith.constant 0 : i32
    %c0_i32_1 = arith.constant 0 : i32
    return %c0_i32, %c0_i32_0 : i32, i32
  }
  func.func @transform_3(%arg0: i32, %arg1: memref<16xi32, #tpu.memory_space<smem>>) -> (i32, i32) {
    %c0_i32 = arith.constant 0 : i32
    %c0_i32_0 = arith.constant 0 : i32
    %c0_i32_1 = arith.constant 0 : i32
    return %c0_i32, %c0_i32_0 : i32, i32
  }
  func.func @transform_4(%arg0: i32, %arg1: memref<16xi32, #tpu.memory_space<smem>>) -> i32 {
    %c0_i32 = arith.constant 0 : i32
    %c0_i32_0 = arith.constant 0 : i32
    return %c0_i32 : i32
  }
  func.func @transform_5(%arg0: i32, %arg1: memref<16xi32, #tpu.memory_space<smem>>) -> (i32, i32) {
    %c0_i32 = arith.constant 0 : i32
    %c0_i32_0 = arith.constant 0 : i32
    return %arg0, %c0_i32 : i32, i32
  }
  func.func @transform_6(%arg0: i32, %arg1: memref<16xi32, #tpu.memory_space<smem>>) -> (i32, i32) {
    %c0_i32 = arith.constant 0 : i32
    %c0_i32_0 = arith.constant 0 : i32
    return %arg0, %c0_i32 : i32, i32
  }
  func.func @transform_7(%arg0: i32, %arg1: memref<16xi32, #tpu.memory_space<smem>>) -> (i32, i32) {
    %c0_i32 = arith.constant 0 : i32
    %c0_i32_0 = arith.constant 0 : i32
    return %arg0, %c0_i32 : i32, i32
  }
}

</mosaic_0001>

<bundles_post_ra>
// kernel: roberta_class_forward.1
= control target key start
LH: loop header
LB: loop body
LE: loop exit
PB: predicated region body
PF: predicated region fallthrough
CT: control target
= control target key end

     0   :  { %s1103_s30 = smov [#allocation5]   ;;  %s1218_s0 = inlined_call_operand.vmem [shape: s32[16], index: 0, kind: input, shape index: {}]   ;;  %s1219_s1 = inlined_call_operand.hbm [shape: f32[65,768], index: 1, kind: input, shape index: {}]   ;;  %s1220_s2 = inlined_call_operand.hbm [shape: bf16[768,128], index: 2, kind: input, shape index: {}]   ;;  %s1221_s3 = inlined_call_operand.vmem [shape: f32[1,128], index: 3, kind: input, shape index: {}]   ;;  %s1222_s4 = inlined_call_operand.vmem [shape: f32[2,128], index: 4, kind: input, shape index: {}]   ;;  %s1223_s5 = inlined_call_operand.vmem [shape: f32[2], index: 5, kind: input, shape index: {}]   ;;  %s1224_s6 = inlined_call_operand.vmem [shape: f32[16,1], index: 6, kind: input, shape index: {}]   ;;  %s1225_s7 = inlined_call_operand.vmem [shape: f32[16,128], index: 7, kind: output, shape index: {0}]   ;;  %s1226_s8 = inlined_call_operand.vmem [shape: f32[8,128], index: 8, kind: output, shape index: {1}]  }
   0x1   :  { %s15_s29 = sshll.u32 %s1218_s0, 4  ;;  %s16_s29 = int_to_ptr.vmem [resolvable:$true] %s15_s29 }
   0x2   :  { %18 = dma.vmem_to_smem %s16_s29, 16, %s1103_s30, [#allocation4] }
   0x3   :  { %1087 = dma.done.wait [#allocation4], 16 }
   0x4   :  { %1088 = vsyncadd [#allocation4], 4294967280 }
   0x5   :  { %21 = sfence }
   0x6   :  { %22 = vsyncpa [#allocation7], 0  ;;  %s28_s11 = sshll.u32 %s1220_s2, 4  ;;  %s29_s11 = int_to_ptr.hbm [resolvable:$true] %s28_s11 }
   0x7   :  { %23 = vsyncpa [#allocation8], 0  ;;  %s1104_s12 = smov [#allocation6]   ;;  %s46_s0 = sshll.u32 %s1223_s5, 4  ;;  %s47_s0 = int_to_ptr.vmem [resolvable:$true] %s46_s0 }
   0x8   :  { %s30_s13 = sshll.u32 %s1104_s12, 4  ;;  %s1105_s16 = smov 64   ;;  %s31_s13 = int_to_ptr.vmem [resolvable:$true] %s30_s13 }
   0x9   :  { %s1106_s17 = smov 4   ;;  %s1107_s18 = smov [#allocation9]  }
   0xa   :  { %36 = dma.hbm_to_vmem [thread:$0]  %s29_s11, 6144, %s31_s13, [#allocation7], %s1105_s16, %s1105_s16, %s1106_s17  }
   0xb   :  { %49 = dma.vmem_to_smem %s47_s0, 16, %s1107_s18, [#allocation8]  }
   0xc   :  { %1089 = dma.done.wait [#allocation7], 6144  }
   0xd   :  { %1090 = vsyncadd [#allocation7], 4294961152 }
   0xe   :  { %1091 = dma.done.wait [#allocation8], 16  }
   0xf   :  { %1092 = vsyncadd [#allocation8], 4294967280 }
  0x10   :  { %60 = sfence }
  0x11   :  { %s1165_s2 = smov 0  }
  0x12 LB: > { %s69_s5 = sld [smem:[#allocation5 + %s1097_s2]]  ;;  %s77_s19 = sshrl.u32 %s1097_s2, 3  ;;  %s1097_s2 = sphi %s1165_s2, %s67_s2  }
  0x13   : > { %s78_s20 = sand.u32 7, %s1097_s2   ;;  %s79_s21 = smul.u32 48, %s77_s19 }
  0x14   : > { %s1059_s15 = scalar_lea.hbm %s1219_s1, 432 }
  0x15   : > { %s80_s22 = sadd.s32 %s79_s21, %s78_s20 }
  0x16   : > { %s81_s26 = scalar_lea.vmem [#allocation2], %s80_s22 }
  0x17   : > { %s1173_s27 = sshll.u32 %s81_s26, 4  ;;  %s85_s27 = int_to_ptr.vmem [resolvable:$true] %s1173_s27 }
  0x18   : > { %p70_p0 = scmp.eq.s32.totalorder %s69_s5, 1 }
  0x1a   : > { %s1228_s5 = smov (%p70_p0, %s69_s5), 64 }
  0x1b   : > { %s72_s23 = sshrl.u32 %s1228_s5, 3  ;;  %s73_s24 = sand.u32 7, %s1228_s5  }
  0x1c   : > { %s74_s25 = smul.u32 48, %s72_s23 }
  0x1e   : > { %s75_s28 = sadd.s32 %s74_s25, %s73_s24 }
  0x1f   : > { %s76_s9 = scalar_lea.hbm %s1219_s1, %s75_s28 }
  0x20   : > { %s1179_s10 = sshll.u32 %s76_s9, 4  ;;  %s83_s10 = int_to_ptr.hbm [resolvable:$true] %s1179_s10 }
  0x21   : > { %s1055_s11 = sshra.s32 %s83_s10, 4  ;;  %s1056_s11 = int_to_ptr.hbm [resolvable:$true] %s1055_s11 }
  0x22   : > { %s1057_s12 = scalar_lea.hbm %s1056_s11, 6  ;;  %p1060_p2 = scmp.lt.s32.totalorder %s1056_s11, %s1219_s1 }
  0x23   : > { %p1058_p1 = scmp.ne.s32.totalorder %s1056_s11, %s1057_s12  ;;  %p1061_p3 = scmp.lt.s32.totalorder %s1059_s15, %s1057_s12 }
  0x25   : > { %p1062_p4 = por %p1061_p3, %p1060_p2 }
  0x27   : > { %p1063_p5 = pnand %p1062_p4, %p1058_p1 }
  0x29   : > { %1066 = shalt.err (!%p1063_p5)  }
  0x2a   : > { %s1067_s17 = sshra.s32 %s85_s27, 4  ;;  %s1108_s5 = smov [#allocation2]   ;;  %s1068_s17 = int_to_ptr.vmem [resolvable:$true] %s1067_s17 }
  0x2b   : > { %s1069_s18 = scalar_lea.vmem %s1068_s17, 6  ;;  %s1071_s19 = scalar_lea.vmem %s1108_s5, 96 }
  0x2c   : > { %p1070_p6 = scmp.ne.s32.totalorder %s1068_s17, %s1069_s18  ;;  %p1072_p7 = scmp.lt.s32.totalorder %s1068_s17, [#allocation2] }
  0x2d   : > { %p1073_p8 = scmp.lt.s32.totalorder %s1071_s19, %s1069_s18 }
  0x2f   : > { %p1074_p9 = por %p1073_p8, %p1072_p7 }
  0x31   : > { %p1075_p10 = pnand %p1074_p9, %p1070_p6 }
  0x33   : > { %1078 = shalt.err (!%p1075_p10)  }
  0x34   : > { %s1109_s20 = smov 128   ;;  %s1110_s21 = smov 1  }
  0x35   : > { %89 = dma.hbm_to_vmem [thread:$0]  %s83_s10, 96, %s85_s27, [#allocation3], %s1109_s20, %s1109_s20, %s1110_s21 }
  0x36   : > { %s67_s2 = sadd.s32 1, %s1097_s2  }
  0x37   : > { %p64_p11 = scmp.ge.s32.totalorder %s67_s2, 16  }
  0x38   :  { %s1099_s22 = smov (%p64_p11), 0  }
  0x39   :  { %66 = sbr.rel (!%p64_p11) target bundleno = 18 (0x12), region = 72 }
  0x3e LB: > { %1093 = dma.done.wait [#allocation3], 96  ;;  %s1101_s22 = sphi %s1099_s22, %s95_s22  }
  0x3f   : > { %1094 = vsyncadd [#allocation3], 4294967200  ;;  %s95_s22 = sadd.s32 1, %s1101_s22  }
  0x40   : > { %p92_p12 = scmp.ge.s32.totalorder %s95_s22, 16  }
  0x41   :  { %v924_v0 = vld [vmem:[#allocation6 + $0x38] sm:$0xff] (%p92_p12)  ;;  %v923_v4 = vld [vmem:[#allocation6 + $0x30] sm:$0xff] (%p92_p12)  ;;  %v922_v8 = vld [vmem:[#allocation6 + $0x28] sm:$0xff] (%p92_p12)  ;;  %s915_s24 = sld [smem:[#allocation9 + $0x1]] (%p92_p12)  ;;  %vm673_vm2 = vcmask (%p92_p12), 7168  }
  0x42   :  { %94 = sbr.rel (!%p92_p12) target bundleno = 62 (0x3e), region = 83  ;;  %v932_v1 = vld [vmem:[#allocation6 + $0x78] sm:$0xff] (%p92_p12)  ;;  %504 = vmatpush.bf16.msra.mxu0 (%p92_p12), %v924_v0  ;;  %v931_v5 = vld [vmem:[#allocation6 + $0x70] sm:$0xff] (%p92_p12)  ;;  %v930_v9 = vld [vmem:[#allocation6 + $0x68] sm:$0xff] (%p92_p12) }
  0x43   :  { %v940_v2 = vld [vmem:[#allocation6 + $0xb8] sm:$0xff] (%p92_p12)  ;;  %518 = vmatpush.bf16.msra.mxu1 (%p92_p12), %v932_v1  ;;  %v939_v6 = vld [vmem:[#allocation6 + $0xb0] sm:$0xff] (%p92_p12)  ;;  %v938_v10 = vld [vmem:[#allocation6 + $0xa8] sm:$0xff] (%p92_p12) }
  0x44   :  { %v948_v3 = vld [vmem:[#allocation6 + $0xf8] sm:$0xff] (%p92_p12)  ;;  %532 = vmatpush.bf16.msra.mxu2 (%p92_p12), %v940_v2  ;;  %v947_v7 = vld [vmem:[#allocation6 + $0xf0] sm:$0xff] (%p92_p12)  ;;  %v946_v11 = vld [vmem:[#allocation6 + $0xe8] sm:$0xff] (%p92_p12) }
  0x45   :  { %546 = vmatpush.bf16.msra.mxu3 (%p92_p12), %v948_v3  ;;  %v921_v12 = vld [vmem:[#allocation6 + $0x20] sm:$0xff] (%p92_p12)  ;;  %v920_v16 = vld [vmem:[#allocation6 + $0x18] sm:$0xff] (%p92_p12)  ;;  %v919_v20 = vld [vmem:[#allocation6 + $0x10] sm:$0xff] (%p92_p12) }
  0x46   :  { %505 = vmatpush.bf16.msra.mxu0 (%p92_p12), %v923_v4  ;;  %v929_v13 = vld [vmem:[#allocation6 + $0x60] sm:$0xff] (%p92_p12)  ;;  %v928_v17 = vld [vmem:[#allocation6 + $0x58] sm:$0xff] (%p92_p12)  ;;  %v927_v21 = vld [vmem:[#allocation6 + $0x50] sm:$0xff] (%p92_p12) }
  0x47   :  { %519 = vmatpush.bf16.msra.mxu1 %v931_v5  ;;  %v937_v14 = vld [vmem:[#allocation6 + $0xa0] sm:$0xff]  ;;  %v936_v18 = vld [vmem:[#allocation6 + $0x98] sm:$0xff]  ;;  %v935_v22 = vld [vmem:[#allocation6 + $0x90] sm:$0xff] }
  0x48   :  { %533 = vmatpush.bf16.msra.mxu2 %v939_v6  ;;  %v945_v15 = vld [vmem:[#allocation6 + $0xe0] sm:$0xff]  ;;  %v944_v19 = vld [vmem:[#allocation6 + $0xd8] sm:$0xff]  ;;  %v943_v23 = vld [vmem:[#allocation6 + $0xd0] sm:$0xff] }
  0x49   :  { %547 = vmatpush.bf16.msra.mxu3 %v947_v7  ;;  %v918_v24 = vld [vmem:[#allocation6 + $0x8] sm:$0xff]  ;;  %v917_v28 = vld [vmem:[#allocation6] sm:$0xff]  ;;  %v104_v31 = vld [vmem:[#allocation2 + $0x30] sm:$0xff] }
  0x4a   :  { %506 = vmatpush.bf16.msra.mxu0 %v922_v8  ;;  %v926_v25 = vld [vmem:[#allocation6 + $0x48] sm:$0xff]  ;;  %v925_v29 = vld [vmem:[#allocation6 + $0x40] sm:$0xff]  ;;  %v105_v33 = vld [vmem:[#allocation2 + $0x38] sm:$0xff] }
  0x4b   :  { %520 = vmatpush.bf16.msra.mxu1 %v930_v9  ;;  %v934_v26 = vld [vmem:[#allocation6 + $0x88] sm:$0xff]  ;;  %v98_v30 = vld [vmem:[#allocation2] sm:$0xff]  ;;  %v956_v34 = vld [vmem:[#allocation6 + $0x138] sm:$0xff] }
  0x4c   :  { %534 = vmatpush.bf16.msra.mxu2 %v938_v10  ;;  %v942_v27 = vld [vmem:[#allocation6 + $0xc8] sm:$0xff]  ;;  %v964_v35 = vld [vmem:[#allocation6 + $0x178] sm:$0xff]  ;;  %v933_v36 = vld [vmem:[#allocation6 + $0x80] sm:$0xff]  ;;  %v110_v40 = vpack.c.bf16 %v104_v31, %v98_v30 }
  0x4d   :  { %548 = vmatpush.bf16.msra.mxu3 %v946_v11  ;;  %v99_v32 = vld [vmem:[#allocation2 + $0x8] sm:$0xff]  ;;  %v941_v37 = vld [vmem:[#allocation6 + $0xc0] sm:$0xff]  ;;  %v100_v38 = vld [vmem:[#allocation2 + $0x10] sm:$0xff] }
  0x4e   :  { %507 = vmatpush.bf16.msra.mxu0 %v921_v12  ;;  %v106_v39 = vld [vmem:[#allocation2 + $0x40] sm:$0xff]  ;;  %v101_v41 = vld [vmem:[#allocation2 + $0x18] sm:$0xff]  ;;  %v107_v42 = vld [vmem:[#allocation2 + $0x48] sm:$0xff]  ;;  %v111_v43 = vpack.c.bf16 %v105_v33, %v99_v32 }
  0x4f   :  { %521 = vmatpush.bf16.msra.mxu1 %v929_v13  ;;  %v955_v44 = vld [vmem:[#allocation6 + $0x130] sm:$0xff]  ;;  %v112_v46 = vpack.c.bf16 %v106_v39, %v100_v38  ;;  %v113_v47 = vpack.c.bf16 %v107_v42, %v101_v41  ;;  %v954_v48 = vld [vmem:[#allocation6 + $0x128] sm:$0xff]  ;;  %v953_v50 = vld [vmem:[#allocation6 + $0x120] sm:$0xff] }
  0x50   :  { %535 = vmatpush.bf16.msra.mxu2 %v937_v14  ;;  %v963_v45 = vld [vmem:[#allocation6 + $0x170] sm:$0xff]  ;;  %v962_v49 = vld [vmem:[#allocation6 + $0x168] sm:$0xff]  ;;  %v961_v51 = vld [vmem:[#allocation6 + $0x160] sm:$0xff] }
  0x51   :  { %549 = vmatpush.bf16.msra.mxu3 %v945_v15  ;;  %v952_v52 = vld [vmem:[#allocation6 + $0x118] sm:$0xff]  ;;  %v951_v54 = vld [vmem:[#allocation6 + $0x110] sm:$0xff]  ;;  %v950_v56 = vld [vmem:[#allocation6 + $0x108] sm:$0xff] }
  0x52   :  { %508 = vmatpush.bf16.msra.mxu0 %v920_v16  ;;  %v960_v53 = vld [vmem:[#allocation6 + $0x158] sm:$0xff]  ;;  %v959_v55 = vld [vmem:[#allocation6 + $0x150] sm:$0xff]  ;;  %v958_v57 = vld [vmem:[#allocation6 + $0x148] sm:$0xff] }
  0x53   :  { %522 = vmatpush.bf16.msra.mxu1 %v928_v17  ;;  %v949_v58 = vld [vmem:[#allocation6 + $0x100] sm:$0xff]  ;;  %v108_v61 = vld [vmem:[#allocation2 + $0x50] sm:$0xff]  ;;  %v103_v62 = vld [vmem:[#allocation2 + $0x28] sm:$0xff] }
  0x54   :  { %536 = vmatpush.bf16.msra.mxu2 %v936_v18  ;;  %v957_v59 = vld [vmem:[#allocation6 + $0x140] sm:$0xff]  ;;  %v109_v63 = vld [vmem:[#allocation2 + $0x58] sm:$0xff] }
  0x55   :  { %550 = vmatpush.bf16.msra.mxu3 %v944_v19  ;;  %v102_v60 = vld [vmem:[#allocation2 + $0x20] sm:$0xff]  ;;  %v115_v1 = vpack.c.bf16 %v109_v63, %v103_v62 }
  0x56   :  { %509 = vmatpush.bf16.msra.mxu0 %v919_v20  ;;  %v114_v0 = vpack.c.bf16 %v108_v61, %v102_v60  ;;  %v990_v4 = vld [vmem:[%s1221_s3] ss:$0 sm:$0xff] }
  0x57   :  { %523 = vmatpush.bf16.msra.mxu1 %v927_v21 }
  0x58   :  { %537 = vmatpush.bf16.msra.mxu2 %v935_v22  ;;  %v590_v22 = vld [vmem:[%s1222_s4] sm:$0x3]  ;;  %s598_s4 = sld [smem:[#allocation9]] }
  0x59   :  { %551 = vmatpush.bf16.msra.mxu3 %v943_v23 }
  0x5a   :  { %510 = vmatpush.bf16.msra.mxu0 %v918_v24 }
  0x5b   :  { %524 = vmatpush.bf16.msra.mxu1 %v926_v25  ;;  %v602_v25 = vperm.slane %v590_v22, 1 }
  0x5c   :  { %538 = vmatpush.bf16.msra.mxu2 %v934_v26  ;;  %v591_v26 = vperm.slane %v590_v22, 0 }
  0x5d   :  { %552 = vmatpush.bf16.msra.mxu3 %v942_v27 }
  0x5e   :  { %511 = vmatpush.bf16.msra.mxu0 %v917_v28 }
  0x5f   :  { %525 = vmatpush.bf16.msra.mxu1 %v925_v29 }
  0x60   :  { %539 = vmatpush.bf16.msra.mxu2 %v933_v36  ;;  %v610_v36 = vstv %s915_s24 }
  0x61   :  { %553 = vmatpush.bf16.msra.mxu3 %v941_v37  ;;  %512 = vmatmul.bf16.vlgmr.msra.gmra.mxu0 %v110_v40  ;;  %v599_v37 = vstv %s598_s4 }
  0x62   :  { %560 = vmatpush.bf16.msrb.mxu0 %v956_v34  ;;  %526 = vmatmul.bf16.vlgmr.msra.gmra.mxu1 %v111_v43 }
  0x63   :  { %574 = vmatpush.bf16.msrb.mxu1 %v964_v35  ;;  %540 = vmatmul.bf16.vlgmr.msra.gmra.mxu2 %v112_v46 }
  0x64   :  { %554 = vmatmul.bf16.vlgmr.msra.gmra.mxu3 %v113_v47 }
  0x66   :  { %561 = vmatpush.bf16.msrb.mxu0 %v955_v44  ;;  %v629_v44 = vlaneseq }
  0x67   :  { %575 = vmatpush.bf16.msrb.mxu1 %v963_v45 }
  0x6a   :  { %562 = vmatpush.bf16.msrb.mxu0 %v954_v48 }
  0x6b   :  { %576 = vmatpush.bf16.msrb.mxu1 %v962_v49  ;;  %v630_v49 = vand.u32 127, %v629_v44 }
  0x6d   :  { %vm632_vm0 = vcmp.eq.s32.totalorder %v630_v49, 1  ;;  %vm631_vm1 = vcmp.eq.s32.totalorder %v630_v49, 0 }
  0x6e   :  { %563 = vmatpush.bf16.msrb.mxu0 %v953_v50 }
  0x6f   :  { %577 = vmatpush.bf16.msrb.mxu1 %v961_v51 }
  0x72   :  { %564 = vmatpush.bf16.msrb.mxu0 %v952_v52 }
  0x73   :  { %578 = vmatpush.bf16.msrb.mxu1 %v960_v53 }
  0x76   :  { %565 = vmatpush.bf16.msrb.mxu0 %v951_v54 }
  0x77   :  { %579 = vmatpush.bf16.msrb.mxu1 %v959_v55 }
  0x7a   :  { %566 = vmatpush.bf16.msrb.mxu0 %v950_v56 }
  0x7b   :  { %580 = vmatpush.bf16.msrb.mxu1 %v958_v57 }
  0x7e   :  { %567 = vmatpush.bf16.msrb.mxu0 %v949_v58 }
  0x7f   :  { %581 = vmatpush.bf16.msrb.mxu1 %v957_v59 }
  0x81   :  { %568 = vmatmul.bf16.vlgmr.msrb.gmra.mxu0 %v114_v0 }
  0x82   :  { %582 = vmatmul.bf16.vlgmr.msrb.gmra.mxu1 %v115_v1 }
  0xde   :  { %v513_v2 = vpop.f32.mrf.mxu0 }
  0xdf   :  { %v527_v3 = vpop.f32.mrf.mxu1  ;;  %v514_v5 = vadd.f32 %v990_v4, %v513_v2 }
  0xe1   :  { %v528_v7 = vadd.f32 %v527_v3, %v514_v5  ;;  %v639_v5 = vld [vmem:[%s1224_s6] sm:$0xff] }
  0xe6   :  { %v541_v6 = vpop.f32.mrf.mxu2  ;;  %v515_v8 = vpop.f32.mrf.mxu0 }
  0xe7   :  { %v529_v9 = vpop.f32.mrf.mxu1  ;;  %v555_v10 = vpop.f32.mrf.mxu3  ;;  %v542_v11 = vadd.f32 %v541_v6, %v528_v7  ;;  %v516_v12 = vadd.f32 %v990_v4, %v515_v8 }
  0xe9   :  { %v556_v13 = vadd.f32 %v555_v10, %v542_v11  ;;  %v530_v14 = vadd.f32 %v529_v9, %v516_v12  ;;  %v657_v9 = vsub.f32 1.0, %v639_v5 }
  0xee   :  { %v543_v15 = vpop.f32.mrf.mxu2 }
  0xef   :  { %v544_v19 = vadd.f32 %v543_v15, %v530_v14  ;;  %v557_v21 = vpop.f32.mrf.mxu3 }
  0xf1   :  { %v558_v23 = vadd.f32 %v557_v21, %v544_v19 }
  0xfe   :  { %v569_v16 = vpop.f32.mrf.mxu0 }
  0xff   :  { %v583_v17 = vpop.f32.mrf.mxu1  ;;  %v570_v18 = vadd.f32 %v569_v16, %v556_v13 }
 0x101   :  { %v584_v20 = vadd.f32 %v583_v17, %v570_v18 }
 0x103   :  { %991 = vtanh.f32 %v584_v20 }
 0x106   :  { %v571_v24 = vpop.f32.mrf.mxu0 }
 0x107   :  { %v572_v27 = vadd.f32 %v571_v24, %v558_v23  ;;  %v585_v28 = vpop.f32.mrf.mxu1  ;;  %v664_v24 = vshrl.u32 %v629_v44, 7 }
 0x109   :  { %v992_v29 = vpop.eup %991  ;;  %v586_v30 = vadd.f32 %v585_v28, %v572_v27  ;;  %vm686_vm3 = vcmp.eq.s32.totalorder %v664_v24, 0 }
 0x10a   :  { %v603_v31 = vmul.f32 %v992_v29, %v602_v25  ;;  %v592_v32 = vmul.f32 %v992_v29, %v591_v26  ;;  %vm687_vm4 = vmand %vm686_vm3, %vm631_vm1 }
 0x10b   :  { %993 = vtanh.f32 %v586_v30 }
 0x10c   :  { %605 = vadd.xlane.f32.xlu1 %v603_v31  ;;  %594 = vadd.xlane.f32.xlu0 %v592_v32 }
 0x111   :  { %v994_v33 = vpop.eup %993 }
 0x112   :  { %v593_v34 = vmul.f32 %v994_v33, %v591_v26  ;;  %v604_v35 = vmul.f32 %v994_v33, %v602_v25 }
 0x114   :  { %596 = vadd.xlane.f32.xlu2 %v593_v34  ;;  %607 = vadd.xlane.f32.xlu1 %v604_v35 }
 0x17f   :  { %v606_v38 = vpop.xlane.xlu1 %605  ;;  %v595_v39 = vpop.xlane.xlu0 %594 }
 0x180   :  { %v611_v40 = vadd.f32 %v610_v36, %v606_v38  ;;  %v600_v41 = vadd.f32 %v599_v37, %v595_v39 }
 0x182   :  { %v621_v42 = vmul.f32 0.5, %v611_v40  ;;  %v613_v43 = vmul.f32 0.5, %v600_v41 }
 0x184   :  { %995 = vtanh.f32 %v621_v42 }
 0x185   :  { %997 = vtanh.f32 %v613_v43 }
 0x187   :  { %v597_v45 = vpop.xlane.xlu2 %596  ;;  %v608_v46 = vpop.xlane.xlu1 %607 }
 0x188   :  { %v601_v47 = vadd.f32 %v599_v37, %v597_v45  ;;  %v612_v48 = vadd.f32 %v610_v36, %v608_v46 }
 0x18a   :  { %v996_v50 = vpop.eup %995  ;;  %v614_v51 = vmul.f32 0.5, %v601_v47  ;;  %v622_v52 = vmul.f32 0.5, %v612_v48 }
 0x18b   :  { %v998_v53 = vpop.eup %997  ;;  %v625_v54 = vadd.f32 1.0, %v996_v50 }
 0x18c   :  { %v617_v55 = vadd.f32 1.0, %v998_v53  ;;  %999 = vtanh.f32 %v614_v51 }
 0x18d   :  { %v627_v56 = vmul.f32 0.5, %v625_v54  ;;  %1001 = vtanh.f32 %v622_v52 }
 0x18e   :  { %v619_v57 = vmul.f32 0.5, %v617_v55 }
 0x18f   :  { %v633_v58 = vsel %vm632_vm0, %v627_v56, 0.0 }
 0x190   :  { %v641_v59 = vadd.f32 1e-10, %v619_v57  ;;  %v649_v60 = vsub.f32 1.0, %v619_v57  ;;  %v635_v61 = vsel %vm631_vm1, %v619_v57, %v633_v58 }
 0x191   :  { %637 = vst [vmem:[%s1225_s7] sm:$0xff] %v635_v61 }
 0x192   :  { %v1000_v62 = vpop.eup %999  ;;  %1003 = vlog2.f32 %v641_v59  ;;  %v651_v63 = vadd.f32 1e-10, %v649_v60 }
 0x193   :  { %v1002_v0 = vpop.eup %1001  ;;  %v618_v1 = vadd.f32 1.0, %v1000_v62 }
 0x194   :  { %v626_v2 = vadd.f32 1.0, %v1002_v0  ;;  %1005 = vlog2.f32 %v651_v63 }
 0x195   :  { %v620_v3 = vmul.f32 0.5, %v618_v1 }
 0x196   :  { %v628_v4 = vmul.f32 0.5, %v626_v2 }
 0x198   :  { %v1004_v6 = vpop.eup %1003  ;;  %v634_v7 = vsel %vm632_vm0, %v628_v4, 0.0 }
 0x199   :  { %v644_v8 = vmul.f32 0.6931472, %v1004_v6  ;;  %v636_v10 = vsel %vm631_vm1, %v620_v3, %v634_v7 }
 0x19a   :  { %v1006_v11 = vpop.eup %1005  ;;  %638 = vst [vmem:[%s1225_s7 + $0x8] sm:$0xff] %v636_v10 }
 0x19b   :  { %v654_v12 = vmul.f32 0.6931472, %v1006_v11  ;;  %v647_v13 = vmul.f32 %v644_v8, %v639_v5 }
 0x19d   :  { %v659_v14 = vmul.f32 %v657_v9, %v654_v12 }
 0x19f   :  { %v661_v15 = vadd.f32 %v659_v14, %v647_v13 }
 0x1a1   :  { %v674_v16 = vsel %vm673_vm2, %v661_v15, 0.0 }
 0x1a2   :  { %677 = vadd.xlane.f32.xlu0 %v674_v16 }
 0x215   :  { %v678_v17 = vpop.xlane.xlu0 %677 }
 0x216   :  { %v679_v18 = vrot.slane %v678_v17, 4 }
 0x218   :  { %v680_v19 = vadd.f32 %v679_v18, %v678_v17 }
 0x21a   :  { %v681_v20 = vrot.slane %v680_v19, 2 }
 0x21c   :  { %v682_v21 = vadd.f32 %v681_v20, %v680_v19 }
 0x21e   :  { %v683_v22 = vrot.slane %v682_v21, 1 }
 0x220   :  { %v684_v23 = vadd.f32 %v683_v22, %v682_v21 }
 0x222   :  { %965 = vpush %v684_v23 }
 0x253   :  { %s966_s6 = spop %965 }
 0x254   :  { %v688_v25 = vstv %s966_s6 }
 0x255   :  { %v689_v26 = vsel %vm687_vm4, %v688_v25, 0.0 }
 0x256   :  { %690 = vst [vmem:[%s1226_s8] sm:$0xff] %v689_v26 }
 0x257   :  { %699 = vsyncpa [#allocation7], 1 }
 0x258   :  { %700 = vsyncpa [#allocation8], 1 }
 0x259   :  { %701 = vsyncmov [#allocation3] }
 0x25c   :  { %s702_s10 = vpop.sfrf %701 }
 0x25d   :  { %p916_p13 = scmp.ne.s32.totalorder %s702_s10, 0 }
 0x25f   :  { %706 = shalt.err (%p916_p13)  }

</bundles_post_ra>
